<compile_context>
chip_gen: v7x
topology: tpu7x:2x2x1
jax: 0.10.0
libtpu: 0.0.40
codegen_flags: <defaults>
</compile_context>

<pallas_src>
import functools
import math

import jax
import jax.numpy as jnp
from jax.experimental import pallas as pl
from jax.experimental.pallas import tpu as pltpu

HIDDEN = 32          # config.hidden_size (small synthetic size)
IN_DIM = 3 * HIDDEN  # dense input dim
BATCH = 24
LN_EPS = 1e-5        # nn.LayerNorm default
INV_SQRT2 = 0.7071067811865476  # constant multiply (cheaper than divide by sqrt(2))


def pooler_kernel(x_ref, w_ref, p_ref, o_ref, *, inv_h):
    # --- dense: y = x @ W^T + b.  bf16 operands on the MXU, f32 accumulation. ---
    y = jnp.dot(x_ref[...].astype(jnp.bfloat16), w_ref[...],
                preferred_element_type=jnp.float32)
    bias  = p_ref[0:1, :]
    gamma = p_ref[1:2, :]
    beta  = p_ref[2:3, :]
    mask  = p_ref[3:4, :]          # 1.0 on the logical H lanes, 0.0 on padding
    y = y + bias

    # --- dropout(p=0.2): identity in eval mode ---
    # TODO(synk): training-mode dropout (stateful PRNG mask) intentionally omitted.

    # --- LayerNorm over the logical H lanes.
    # Padded lanes of y are exactly 0 (zero-padded weight columns + zero bias), so the
    # mean needs no masking; only the centered values need the mask multiply. ---
    mean = jnp.sum(y, axis=-1, keepdims=True) * inv_h
    diff = (y - mean) * mask
    var = jnp.sum(diff * diff, axis=-1, keepdims=True) * inv_h
    y_hat = diff * jax.lax.rsqrt(var + LN_EPS)      # rsqrt -> EUP slot
    y_hat = y_hat * gamma + beta

    # --- ACT2FN["gelu"]: exact erf GELU (matches the PyTorch module semantics). ---
    out = 0.5 * y_hat * (1.0 + jax.lax.erf(y_hat * INV_SQRT2))
    o_ref[...] = out.astype(o_ref.dtype)


def model_response_pooler(x, weight, bias, gamma, beta, *, block_b=256):
    """x: [B, 3H] f32; weight: [H, 3H] (PyTorch Linear layout); bias/gamma/beta: [H]."""
    B, IN = x.shape
    H = weight.shape[0]

    # Lane-dense padding: output axis and contraction axis to multiples of 128.
    Hp = max(128, ((H + 127) // 128) * 128)
    INp = max(128, ((IN + 127) // 128) * 128)

    # Batch tile: biggest tile <= block_b (multiple of 8); pad batch to a multiple of TB.
    if B <= block_b:
        TB = ((B + 7) // 8) * 8
    else:
        TB = (block_b // 8) * 8
    Bp = pl.cdiv(B, TB) * TB

    x_p = jnp.pad(x, ((0, Bp - B), (0, INp - IN))) if (Bp != B or INp != IN) else x

    # One-time parameter preprocessing: transpose, zero-pad, weight stored in bf16.
    w_t = jnp.pad(weight.T, ((0, INp - IN), (0, Hp - H))).astype(jnp.bfloat16)  # [INp, Hp]
    pad_h = Hp - H
    params = jnp.stack([
        jnp.pad(bias.astype(jnp.float32), (0, pad_h)),                 # row 0: bias
        jnp.pad(gamma.astype(jnp.float32), (0, pad_h)),                # row 1: gamma
        jnp.pad(beta.astype(jnp.float32), (0, pad_h)),                 # row 2: beta
        jnp.pad(jnp.ones((H,), jnp.float32), (0, pad_h)),              # row 3: lane mask
    ], axis=0)                                                         # [4, Hp]

    kernel = functools.partial(pooler_kernel, inv_h=1.0 / float(H))
    out_p = pl.pallas_call(
        kernel,
        out_shape=jax.ShapeDtypeStruct((Bp, Hp), jnp.float32),
        grid=(Bp // TB,),
        in_specs=[
            pl.BlockSpec((TB, INp), lambda i: (i, 0)),   # batch-tiled activations (pipelined)
            pl.BlockSpec((INp, Hp), lambda i: (0, 0)),   # weight resident across grid steps
            pl.BlockSpec((4, Hp), lambda i: (0, 0)),     # bias/gamma/beta/mask (resident)
        ],
        out_specs=pl.BlockSpec((TB, Hp), lambda i: (i, 0)),   # lane-dense (128) output
        compiler_params=pltpu.CompilerParams(
            dimension_semantics=("parallel",)),               # megacore / v7x dual-TC
    )(x_p, w_t, params)
    return out_p[:B, :H]


def reference(x, weight, bias, gamma, beta, matmul_dtype):
    y = jnp.dot(x.astype(matmul_dtype), weight.T.astype(matmul_dtype),
                preferred_element_type=jnp.float32) + bias
    mean = y.mean(axis=-1, keepdims=True)
    var = ((y - mean) ** 2).mean(axis=-1, keepdims=True)
    y = (y - mean) * jax.lax.rsqrt(var + LN_EPS)
    y = y * gamma + beta
    return 0.5 * y * (1.0 + jax.lax.erf(y * INV_SQRT2))


if __name__ == "__main__":
    key = jax.random.PRNGKey(0)
    k_x, k_w, k_b, k_g, k_be = jax.random.split(key, 5)

    # deterministic synthetic parameters (Linear: weight [H, 3H], bias [H])
    bound = 1.0 / math.sqrt(IN_DIM)
    weight = jax.random.uniform(k_w, (HIDDEN, IN_DIM), jnp.float32, -bound, bound)
    bias = jax.random.uniform(k_b, (HIDDEN,), jnp.float32, -bound, bound)
    # LayerNorm params (init: ones / zeros; perturb slightly so they matter)
    gamma = 1.0 + 0.05 * jax.random.normal(k_g, (HIDDEN,), jnp.float32)
    beta = 0.05 * jax.random.normal(k_be, (HIDDEN,), jnp.float32)

    x = jax.random.normal(k_x, (BATCH, IN_DIM), jnp.float32)

    # block_b=16 -> TB=16, Bp=32, grid=(2,): exercises batch tiling AND batch padding.
    out = model_response_pooler(x, weight, bias, gamma, beta, block_b=16)
    out = jax.block_until_ready(out)
    assert out.shape == (BATCH, HIDDEN)

    ref_matched = reference(x, weight, bias, gamma, beta, jnp.bfloat16)  # same matmul precision
    ref_f32 = reference(x, weight, bias, gamma, beta, jnp.float32)       # module semantics
    assert jnp.allclose(out, ref_matched, atol=1e-4, rtol=1e-4), "mismatch vs matched-precision reference"
    assert jnp.allclose(out, ref_f32, atol=5e-2, rtol=5e-2), "mismatch vs f32 reference"

    print("KERNEL_OK")
</pallas_src>

<mosaic_0001>
module attributes {stable_mosaic.version = 11 : i64} {
  func.func @pooler_kernel(%arg0: i32, %arg1: memref<16x128xf32, #tpu.memory_space<vmem>>, %arg2: memref<128x128xbf16, #tpu.memory_space<vmem>>, %arg3: memref<4x128xf32, #tpu.memory_space<vmem>>, %arg4: memref<16x128xf32, #tpu.memory_space<vmem>>) attributes {dimension_semantics = [#tpu.dimension_semantics<parallel>], iteration_bounds = array<i64: 2>, scalar_prefetch = 0 : i64, scratch_operands = 0 : i64, tpu.core_type = #tpu.core_type<tc>, window_params = [{transform_indices = @transform_0, window_bounds = array<i64: 16, 128>}, {pipeline_mode = #tpu.pipeline_mode<synchronous>, transform_indices = @transform_1, window_bounds = array<i64: 128, 128>}, {pipeline_mode = #tpu.pipeline_mode<synchronous>, transform_indices = @transform_2, window_bounds = array<i64: 4, 128>}, {transform_indices = @transform_3, window_bounds = array<i64: 16, 128>}]} {
    %c0 = arith.constant 0 : index
    %c0_0 = arith.constant 0 : index
    %0 = vector.load %arg1[%c0, %c0_0] : memref<16x128xf32, #tpu.memory_space<vmem>>, vector<16x128xf32>
    %1 = arith.truncf %0 : vector<16x128xf32> to vector<16x128xbf16>
    %c0_1 = arith.constant 0 : index
    %c0_2 = arith.constant 0 : index
    %2 = vector.load %arg2[%c0_1, %c0_2] : memref<128x128xbf16, #tpu.memory_space<vmem>>, vector<128x128xbf16>
    %cst = arith.constant dense<0.000000e+00> : vector<16x128xf32>
    %3 = tpu.matmul %1, %2, %cst {dimension_numbers = #tpu.dot_dimension_numbers<[1], [0], [0], [1], [0, 0, 1, 1], [], []>} : vector<16x128xbf16>, vector<128x128xbf16>, vector<16x128xf32> -> vector<16x128xf32>
    %c0_3 = arith.constant 0 : index
    %c0_4 = arith.constant 0 : index
    %4 = vector.load %arg3[%c0_3, %c0_4] : memref<4x128xf32, #tpu.memory_space<vmem>>, vector<1x128xf32>
    %c1 = arith.constant 1 : index
    %c0_5 = arith.constant 0 : index
    %5 = vector.load %arg3[%c1, %c0_5] : memref<4x128xf32, #tpu.memory_space<vmem>>, vector<1x128xf32>
    %c2 = arith.constant 2 : index
    %c0_6 = arith.constant 0 : index
    %6 = vector.load %arg3[%c2, %c0_6] : memref<4x128xf32, #tpu.memory_space<vmem>>, vector<1x128xf32>
    %c3 = arith.constant 3 : index
    %c0_7 = arith.constant 0 : index
    %7 = vector.load %arg3[%c3, %c0_7] : memref<4x128xf32, #tpu.memory_space<vmem>>, vector<1x128xf32>
    %8 = vector.broadcast %4 : vector<1x128xf32> to vector<16x128xf32>
    %9 = arith.addf %3, %8 : vector<16x128xf32>
    %cst_8 = arith.constant dense<0.000000e+00> : vector<16xf32>
    %10 = vector.multi_reduction <add>, %9, %cst_8 [1] : vector<16x128xf32> to vector<16xf32>
    %11 = vector.shape_cast %10 : vector<16xf32> to vector<16x1xf32>
    %cst_9 = arith.constant 3.125000e-02 : f32
    %12 = vector.broadcast %cst_9 : f32 to vector<16x1xf32>
    %13 = arith.mulf %11, %12 : vector<16x1xf32>
    %14 = vector.broadcast %13 : vector<16x1xf32> to vector<16x128xf32>
    %15 = arith.subf %9, %14 : vector<16x128xf32>
    %16 = vector.broadcast %7 : vector<1x128xf32> to vector<16x128xf32>
    %17 = arith.mulf %15, %16 : vector<16x128xf32>
    %18 = arith.mulf %17, %17 : vector<16x128xf32>
    %cst_10 = arith.constant dense<0.000000e+00> : vector<16xf32>
    %19 = vector.multi_reduction <add>, %18, %cst_10 [1] : vector<16x128xf32> to vector<16xf32>
    %20 = vector.shape_cast %19 : vector<16xf32> to vector<16x1xf32>
    %cst_11 = arith.constant 3.125000e-02 : f32
    %21 = vector.broadcast %cst_11 : f32 to vector<16x1xf32>
    %22 = arith.mulf %20, %21 : vector<16x1xf32>
    %cst_12 = arith.constant 9.99999974E-6 : f32
    %23 = vector.broadcast %cst_12 : f32 to vector<16x1xf32>
    %24 = arith.addf %22, %23 : vector<16x1xf32>
    %25 = math.rsqrt %24 : vector<16x1xf32>
    %26 = vector.broadcast %25 : vector<16x1xf32> to vector<16x128xf32>
    %27 = arith.mulf %17, %26 : vector<16x128xf32>
    %28 = vector.broadcast %5 : vector<1x128xf32> to vector<16x128xf32>
    %29 = arith.mulf %27, %28 : vector<16x128xf32>
    %30 = vector.broadcast %6 : vector<1x128xf32> to vector<16x128xf32>
    %31 = arith.addf %29, %30 : vector<16x128xf32>
    %cst_13 = arith.constant 5.000000e-01 : f32
    %32 = vector.broadcast %cst_13 : f32 to vector<16x128xf32>
    %33 = arith.mulf %32, %31 : vector<16x128xf32>
    %cst_14 = arith.constant 0.707106769 : f32
    %34 = vector.broadcast %cst_14 : f32 to vector<16x128xf32>
    %35 = arith.mulf %31, %34 : vector<16x128xf32>
    %36 = math.erf %35 : vector<16x128xf32>
    %cst_15 = arith.constant 1.000000e+00 : f32
    %37 = vector.broadcast %cst_15 : f32 to vector<16x128xf32>
    %38 = arith.addf %37, %36 : vector<16x128xf32>
    %39 = arith.mulf %33, %38 : vector<16x128xf32>
    %c0_16 = arith.constant 0 : index
    %c0_17 = arith.constant 0 : index
    %40 = vector.load %arg4[%c0_16, %c0_17] : memref<16x128xf32, #tpu.memory_space<vmem>>, vector<16x128xf32>
    tpu.vector_store %arg4[%c0_16, %c0_17], %39 {strides = array<i32>} : memref<16x128xf32, #tpu.memory_space<vmem>>, vector<16x128xf32>,
    return
  }
  func.func @transform_0(%arg0: i32) -> (i32, i32) {
    %c0_i32 = arith.constant 0 : i32
    %c0_i32_0 = arith.constant 0 : i32
    return %arg0, %c0_i32 : i32, i32
  }
  func.func @transform_1(%arg0: i32) -> (i32, i32) {
    %c0_i32 = arith.constant 0 : i32
    %c0_i32_0 = arith.constant 0 : i32
    %c0_i32_1 = arith.constant 0 : i32
    return %c0_i32, %c0_i32_0 : i32, i32
  }
  func.func @transform_2(%arg0: i32) -> (i32, i32) {
    %c0_i32 = arith.constant 0 : i32
    %c0_i32_0 = arith.constant 0 : i32
    %c0_i32_1 = arith.constant 0 : i32
    return %c0_i32, %c0_i32_0 : i32, i32
  }
  func.func @transform_3(%arg0: i32) -> (i32, i32) {
    %c0_i32 = arith.constant 0 : i32
    %c0_i32_0 = arith.constant 0 : i32
    return %arg0, %c0_i32 : i32, i32
  }
}

</mosaic_0001>

<bundles_post_ra>
// kernel: tpu_custom_call.1
= control target key start
LH: loop header
LB: loop body
LE: loop exit
PB: predicated region body
PF: predicated region fallthrough
CT: control target
= control target key end

     0   :  { %8 = vsyncpa [#allocation3], 0  ;;  %s994_s0 = inlined_call_operand.hbm [shape: f32[32,128], index: 0, kind: input, shape index: {}]   ;;  %s995_s1 = inlined_call_operand.hbm [shape: bf16[128,128], index: 1, kind: input, shape index: {}]   ;;  %s996_s2 = inlined_call_operand.vmem [shape: f32[4,128], index: 2, kind: input, shape index: {}]   ;;  %s997_s3 = inlined_call_operand.hbm [shape: f32[32,128], index: 3, kind: output, shape index: {}]  }
   0x1   :  { %10 = vsyncpa [#allocation3 + $0x1], 0 }
   0x2   :  { %11 = vsyncpa [#allocation6], 0 }
   0x3   :  { %12 = vsyncpa [#allocation4], 0 }
   0x4   :  { %14 = vsyncpa [#allocation4 + $0x1], 0  ;;  %s773_s12 = smov 0   ;;  %s775_s13 = smov 0  }
   0x5   :  { %s777_s14 = smov 0   ;;  %s779_s15 = smov 0  }
   0x6 LB: > { %s794_s16 = sadd.s32 4294967295, %s740_s15   ;;  %s472_s17 = sadd.s32 4294967294, %s740_s15   ;;  %s740_s15 = sphi %s779_s15, %s1017_s15   ;;  %s736_s14 = sphi %s777_s14, %s1016_s14   ;;  %s732_s13 = sphi %s775_s13, %s1015_s13   ;;  %s728_s12 = sphi %s773_s12, %s1014_s12  }
   0x7   : > { %p40_p0 = scmp.ne.s32.totalorder %s732_s13, %s728_s12  ;;  %p998_p1 = scmp.eq.s32.totalorder %s794_s16, 0 }
   0x8   : > { %p112_p3 = scmp.eq.s32.totalorder %s472_s17, 1  ;;  %p473_p5 = scmp.ge.s32.totalorder %s740_s15, 1 }
   0x9   : > { %p803_p4 = por %p998_p1, %p40_p0  ;;  %p119_p7 = scmp.lt.s32.totalorder %s740_s15, 3 }
   0xa   : > { %p808_p6 = por %p112_p3, %p40_p0  ;;  %s742_s21 = smov [#allocation5]  }
   0xb   : > { %s1001_s18 = scalar_select %p803_p4, 1, 0 }
   0xc   : > { %s1002_s19 = scalar_select %p808_p6, 1, 0 }
   0xd   : > { %p813_p8 = pnand %p473_p5, %p119_p7  ;;  %s131_s22 = sshll.u32 %s742_s21, 4  ;;  %s817_s22 = int_to_ptr.vmem [resolvable:$true] %s131_s22 }
   0xe   : > { %s829_s24 = sadd.s32 1, %s740_s15   ;;  %s27_s25 = sadd.s32 1, %s736_s14 }
   0xf   : > { %s1003_s20 = scalar_select %p813_p8, 1, 0 }
  0x10   : > { %p539_p9 = pneg %p813_p8  ;;  %s24_s26 = ssub.s32 %s740_s15, %s829_s24 }
  0x11   : > { %s612_s29 = scalar_lea.hbm %s995_s1, 1024 }
  0x12   : > { %p824_p11 = pnand %p539_p9, %p998_p1  ;;  %p613_p12 = scmp.ne.s32.totalorder %s995_s1, %s612_s29 }
  0x13   : > { %p619_p5 = scmp.lt.u32.totalorder %s612_s29, %s995_s1 }
  0x14   : > { %p614_p13 = pneg %p824_p11 }
  0x16   : > { %p615_p0 = pnand %p614_p13, %p613_p12 }
  0x18   : > { %p616_p3 = pneg %p615_p0 }
  0x1a   : > { %p621_p7 = pnand %p619_p5, %p616_p3 }
  0x1c   : > { %624 = shalt.err (!%p621_p7)
}
  0x1d   : > { %s625_s7 = scalar_lea.vmem %s817_s22, 1024  ;;  %p633_p2 = scmp.lt.s32.totalorder %s817_s22, %s817_s22 }
  0x1e   : > { %p626_p9 = scmp.ne.s32.totalorder %s817_s22, %s625_s7  ;;  %p634_p6 = scmp.lt.s32.totalorder %s625_s7, %s625_s7 }
  0x20   : > { %p628_p10 = pnand %p626_p9, %p614_p13  ;;  %p635_p4 = por %p634_p6, %p633_p2 }
  0x22   : > { %p629_p1 = pneg %p628_p10 }
  0x24   : > { %p636_p8 = pnand %p635_p4, %p629_p1 }
  0x26   : > { %639 = shalt.err (!%p636_p8)
}
  0x27   : > { %s743_s8 = smov 64   ;;  %s744_s9 = smov 4  }
  0x28   : > { %542 = dma.hbm_to_vmem [thread:$0]  (!%p824_p11), %s995_s1, 1024, %s817_s22, [#allocation6], %s743_s8, %s743_s8, %s744_s9  }
  0x29   : > { %p25_p2 = scmp.eq.s32.totalorder %s24_s26, 0  ;;  %p34_p1 = scmp.ne.s32.totalorder %s736_s14, %s732_s13 }
  0x2a   : > { %p35_p4 = scmp.eq.s32.totalorder %s740_s15, 0  ;;  %p552_p6 = scmp.lt.s32.totalorder %s740_s15, 2 }
  0x2b   : > { %s860_s17 = scalar_select %p25_p2, %s736_s14, %s27_s25  }
  0x2c   : > { %p36_p8 = por %p35_p4, %p34_p1  ;;  %p1005_p10 = scmp.eq.s32.totalorder %s794_s16, 1 }
  0x2d   : > { %s148_s27 = sand.u32 1, %s736_s14   ;;  %s500_s28 = sshll.u32 %s740_s15, 8 }
  0x2e   : > { %p864_p12 = por %p1005_p10, %p34_p1  ;;  %s476_s29 = sshll.u32 %s148_s27, 4 }
  0x2f   : > { %s873_s4 = scalar_lea.hbm %s994_s0, %s500_s28  ;;  %s152_s22 = scalar_lea.vmem [#allocation2], %s476_s29 }
  0x30   : > { %s159_s25 = sshll.u32 %s152_s22, 4  ;;  %p875_p11 = pnand %p552_p6, %p36_p8  ;;  %s879_s25 = int_to_ptr.vmem [resolvable:$true] %s159_s25 }
  0x31   : > { %s881_s5 = scalar_lea.sflag [#allocation3], %s148_s27  ;;  %s640_s6 = scalar_lea.hbm %s873_s4, 256 }
  0x32   : > { %p641_p13 = scmp.ne.s32.totalorder %s873_s4, %s640_s6  ;;  %p642_p0 = pneg %p875_p11 }
  0x33   : > { %s645_s9 = scalar_lea.hbm %s994_s0, 512  ;;  %p646_p7 = scmp.lt.u32.totalorder %s873_s4, %s994_s0 }
  0x34   : > { %p643_p3 = pnand %p642_p0, %p641_p13  ;;  %p647_p9 = scmp.lt.u32.totalorder %s645_s9, %s640_s6 }
  0x35   : > { %p649_p1 = scmp.lt.u32.totalorder %s640_s6, %s873_s4 }
  0x36   : > { %p644_p5 = pneg %p643_p3  ;;  %p648_p2 = por %p647_p9, %p646_p7 }
  0x38   : > { %p650_p4 = por %p649_p1, %p648_p2 }
  0x3a   : > { %p651_p6 = pnand %p650_p4, %p644_p5 }
  0x3c   : > { %654 = shalt.err (!%p651_p6)
}
  0x3d   : > { %s655_s27 = scalar_lea.vmem %s879_s25, 256  ;;  %s745_s28 = smov [#allocation2]  }
  0x3e   : > { %p656_p8 = scmp.ne.s32.totalorder %s879_s25, %s655_s27  ;;  %s660_s29 = sshll.u32 %s745_s28, 4  ;;  %s661_s29 = int_to_ptr.vmem [resolvable:$false] %s660_s29 }
  0x3f   : > { %s662_s23 = scalar_lea.vmem %s661_s29, 512  ;;  %p663_p3 = scmp.lt.s32.totalorder %s879_s25, %s661_s29 }
  0x40   : > { %p658_p10 = pnand %p656_p8, %p642_p0  ;;  %p664_p7 = scmp.lt.s32.totalorder %s662_s23, %s655_s27 }
  0x42   : > { %p659_p13 = pneg %p658_p10  ;;  %p665_p9 = por %p664_p7, %p663_p3 }
  0x44   : > { %p666_p2 = pnand %p665_p9, %p659_p13 }
  0x46   : > { %669 = shalt.err (!%p666_p2)
}
  0x47   : > { %s746_s30 = smov 128   ;;  %s747_s22 = smov 8  }
  0x48   : > { %546 = dma.hbm_to_vmem [thread:$0]  (!%p875_p11), %s873_s4, 256, %s879_s25, %s881_s5, %s746_s30, %s746_s30, %s747_s22  }
  0x49   : > { %p1008_p0 = scmp.ne.s32.totalorder %s1003_s20, 0 }
  0x4a   : > { %s912_s6 = sand.u32 (!%p1008_p0), 1, %s732_s13   ;;  %p1009_p5 = scmp.ne.s32.totalorder (!%p1008_p0), %s1001_s18, 0 }
  0x4b   : > { %171 = sbr.rel (%p1008_p0) target bundleno = 682 (0x2aa), region = 32  ;;  %s480_s7 = sshll.u32 (!%p1008_p0), %s912_s6, 4 }
  0x4c   : > { %s174_s8 = scalar_lea.sflag (!%p1008_p0), [#allocation3], %s912_s6  ;;  %s918_s9 = scalar_lea.vmem (!%p1008_p0), [#allocation2], %s480_s7 }
  0x52   : > { %715 = dma.done.wait (%p1009_p5), %s174_s8, 256  }
  0x53   : > { %717 = vsyncadd (%p1009_p5), %s174_s8, 4294967040  ;;  %p1010_p11 = scmp.eq.s32.totalorder %s794_s16, 0 }
  0x55   : > { %719 = dma.done.wait (%p1010_p11), [#allocation6], 1024   ;;  %p1011_p1 = pmov %p1010_p11 }
  0x56   : > { %v748_v0 = vmov 0.0   ;;  %vm749_vm0 = vmmov 0   ;;  %v596_v1 = vld [vmem:[#allocation5] sm:$0xff]   ;;  %v597_v2 = vld [vmem:[#allocation5 + $0x8] sm:$0xff]   ;;  %v598_v3 = vld [vmem:[#allocation5 + $0x10] sm:$0xff]   ;;  %s501_s27 = sshll.u32 %s794_s16, 8 }
  0x57   : > { %721 = vsyncadd (%p1011_p1), [#allocation6], 4294966272  ;;  %511 = vmatprep.subr.bf16.mxu0 %v748_v0  ;;  %527 = vmatprep.mubr.msk.bf16.mxu0 %vm749_vm0, %v748_v0  ;;  %v599_v4 = vld [vmem:[#allocation5 + $0x18] sm:$0xff]   ;;  %v600_v5 = vld [vmem:[#allocation5 + $0x20] sm:$0xff]   ;;  %s203_s28 = scalar_lea.vmem [#allocation7], %s480_s7  ;;  %s948_s22 = scalar_lea.hbm %s997_s3, %s501_s27 }
  0x58   : > { %512 = vmatpush3.bf16.msra.mxu0 %v596_v1  ;;  %v601_v6 = vld [vmem:[#allocation5 + $0x28] sm:$0xff]   ;;  %v602_v7 = vld [vmem:[#allocation5 + $0x30] sm:$0xff]   ;;  %v603_v8 = vld [vmem:[#allocation5 + $0x38] sm:$0xff]   ;;  %s389_s29 = sshll.u32 %s203_s28, 4  ;;  %s376_s16 = scalar_lea.sflag [#allocation4], %s912_s6  ;;  %s950_s29 = int_to_ptr.vmem [resolvable:$true] %s389_s29 }
  0x59   : > { %513 = vmatprep.subr.bf16.mxu0 %v748_v0  ;;  %v207_v9 = vld [vmem:[%s918_s9] sm:$0xff]  ;;  %v208_v10 = vld [vmem:[%s918_s9 + $0x8] sm:$0xff]  ;;  %s670_s8 = scalar_lea.vmem %s950_s29, 256  ;;  %s750_s7 = smov [#allocation7]  }
  0x5a   : > { %v209_v11 = vpack.c.bf16 %v208_v10, %v207_v9  ;;  %v483_v12 = vld [vmem:[%s996_s2] ss:$0 sm:$0xff]  ;;  %v492_v21 = vld [vmem:[%s996_s2 + $0x3] ss:$0 sm:$0xff]  ;;  %v493_v37 = vld [vmem:[%s996_s2 + $0x1] ss:$0 sm:$0xff]  ;;  %p671_p4 = scmp.ne.s32.totalorder %s950_s29, %s670_s8 }
  0x5b   : > { %v494_v39 = vld [vmem:[%s996_s2 + $0x2] ss:$0 sm:$0xff]  ;;  %s674_s9 = sshll.u32 %s750_s7, 4  ;;  %s675_s9 = int_to_ptr.vmem [resolvable:$false] %s674_s9 }
  0x5c   : > { %514 = vmatpush3.bf16.msra.mxu0 %v597_v2  ;;  %p672_p6 = pnand %p671_p4, %p864_p12  ;;  %s676_s18 = scalar_lea.vmem %s675_s9, 512 }
  0x5d   : > { %515 = vmatprep.subr.bf16.mxu0 %v748_v0  ;;  %p677_p10 = scmp.lt.s32.totalorder %s950_s29, %s675_s9  ;;  %p678_p13 = scmp.lt.s32.totalorder %s676_s18, %s670_s8 }
  0x5e   : > { %p673_p8 = pneg %p672_p6 }
  0x5f   : > { %p679_p3 = por %p678_p13, %p677_p10 }
  0x60   : > { %516 = vmatpush3.bf16.msra.mxu0 %v598_v3 }
  0x61   : > { %517 = vmatprep.subr.bf16.mxu0 %v748_v0  ;;  %p680_p7 = pnand %p679_p3, %p673_p8 }
  0x64   : > { %518 = vmatpush3.bf16.msra.mxu0 %v599_v4 }
  0x65   : > { %519 = vmatprep.subr.bf16.mxu0 %v748_v0 }
  0x68   : > { %520 = vmatpush3.bf16.msra.mxu0 %v600_v5 }
  0x69   : > { %521 = vmatprep.subr.bf16.mxu0 %v748_v0 }
  0x6c   : > { %522 = vmatpush3.bf16.msra.mxu0 %v601_v6 }
  0x6d   : > { %523 = vmatprep.subr.bf16.mxu0 %v748_v0 }
  0x70   : > { %524 = vmatpush3.bf16.msra.mxu0 %v602_v7 }
  0x71   : > { %525 = vmatprep.subr.bf16.mxu0 %v748_v0 }
  0x74   : > { %526 = vmatpush3.bf16.msra.mxu0 %v603_v8 }
  0x77   : > { %528 = vmatmul.mubr.bf16.vlgmr.msra.gmra.mrb[0].mxu0 %v209_v11 }
 0x14a   : > { %v316_v13 = vpop.f32.mrb[0].mxu0 }
 0x14b   : > { %v317_v14 = vadd.f32 %v483_v12, %v316_v13  ;;  %v529_v15 = vpop.f32.mrb[1].mxu0 }
 0x14c   : > { %v319_v16 = vpop.f32.mrb[2].mxu0 }
 0x14d   : > { %323 = vadd.xlane.f32.xlu0 %v317_v14  ;;  %v530_v17 = vpop.f32.mrb[3].mxu0  ;;  %v320_v18 = vadd.f32 %v483_v12, %v319_v16 }
 0x151   : > { %325 = vadd.xlane.f32.xlu0 %v320_v18 }
 0x1da   : > { %v324_v19 = vpop.xlane.xlu0 %323 }
 0x1db   : > { %v327_v20 = vmul.f32 0.03125, %v324_v19 }
 0x1dd   : > { %v329_v22 = vsub.f32 %v317_v14, %v327_v20 }
 0x1de   : > { %v326_v23 = vpop.xlane.xlu0 %325 }
 0x1df   : > { %v328_v24 = vmul.f32 0.03125, %v326_v23  ;;  %v335_v25 = vmul.f32 %v492_v21, %v329_v22 }
 0x1e1   : > { %v330_v26 = vsub.f32 %v320_v18, %v328_v24  ;;  %v337_v27 = vmul.f32 %v335_v25, %v335_v25 }
 0x1e3   : > { %339 = vadd.xlane.f32.xlu1 %v337_v27  ;;  %v336_v28 = vmul.f32 %v492_v21, %v330_v26 }
 0x1e5   : > { %v338_v29 = vmul.f32 %v336_v28, %v336_v28 }
 0x1e7   : > { %341 = vadd.xlane.f32.xlu1 %v338_v29 }
 0x270   : > { %v340_v30 = vpop.xlane.xlu1 %339 }
 0x271   : > { %v343_v31 = vmul.f32 0.03125, %v340_v30 }
 0x273   : > { %v345_v32 = vadd.f32 1e-05, %v343_v31 }
 0x274   : > { %v342_v33 = vpop.xlane.xlu1 %341 }
 0x275   : > { %604 = vrsqrt.f32 %v345_v32  ;;  %v344_v34 = vmul.f32 0.03125, %v342_v33 }
 0x277   : > { %v346_v35 = vadd.f32 1e-05, %v344_v34 }
 0x279   : > { %606 = vrsqrt.f32 %v346_v35 }
 0x27f   : > { %v605_v36 = vpop.eup %604 }
 0x280   : > { %v349_v38 = vmul.f32 %v605_v36, %v335_v25 }
 0x282   : > { %v355_v40 = vmul.f32 %v493_v37, %v349_v38 }
 0x283   : > { %v607_v41 = vpop.eup %606 }
 0x284   : > { %v361_v42 = vadd.f32 %v494_v39, %v355_v40  ;;  %v350_v43 = vmul.f32 %v607_v41, %v336_v28 }
 0x286   : > { %v365_v44 = vmul.f32 0.70710677, %v361_v42  ;;  %v356_v45 = vmul.f32 %v493_v37, %v350_v43  ;;  %v363_v49 = vmul.f32 0.5, %v361_v42 }
 0x288   : > { %608 = verf.f32 %v365_v44  ;;  %v362_v46 = vadd.f32 %v494_v39, %v356_v45 }
 0x28a   : > { %v366_v47 = vmul.f32 0.70710677, %v362_v46  ;;  %v364_v53 = vmul.f32 0.5, %v362_v46 }
 0x28c   : > { %610 = verf.f32 %v366_v47 }
 0x292   : > { %v609_v48 = vpop.eup %608 }
 0x293   : > { %v369_v50 = vadd.f32 1.0, %v609_v48 }
 0x295   : > { %v371_v51 = vmul.f32 %v369_v50, %v363_v49 }
 0x296   : > { %v611_v52 = vpop.eup %610 }
 0x297   : > { %v370_v54 = vadd.f32 1.0, %v611_v52  ;;  %373 = vst [vmem:[%s203_s28] sm:$0xff] %v371_v51 }
 0x299   : > { %v372_v55 = vmul.f32 %v370_v54, %v364_v53 }
 0x29b   : > { %374 = vst [vmem:[%s203_s28 + $0x8] sm:$0xff] %v372_v55 }
 0x29c   : > { %683 = shalt.err (!%p680_p7)
}
 0x29d   : > { %s684_s20 = scalar_lea.hbm %s948_s22, 256  ;;  %s688_s26 = scalar_lea.hbm %s997_s3, 512 }
 0x29e   : > { %p685_p9 = scmp.ne.s32.totalorder %s948_s22, %s684_s20  ;;  %p689_p5 = scmp.lt.u32.totalorder %s948_s22, %s997_s3 }
 0x29f   : > { %p690_p11 = scmp.lt.u32.totalorder %s688_s26, %s684_s20  ;;  %p692_p4 = scmp.lt.u32.totalorder %s684_s20, %s948_s22 }
 0x2a0   : > { %p686_p2 = pnand %p685_p9, %p864_p12 }
 0x2a1   : > { %p691_p1 = por %p690_p11, %p689_p5 }
 0x2a2   : > { %p687_p0 = pneg %p686_p2 }
 0x2a3   : > { %p693_p6 = por %p692_p4, %p691_p1 }
 0x2a5   : > { %p694_p8 = pnand %p693_p6, %p687_p0 }
 0x2a7   : > { %697 = shalt.err (!%p694_p8)
}
 0x2a8   : > { %s751_s11 = smov 128   ;;  %s752_s27 = smov 8  }
 0x2a9   : > { %537 = dma.vmem_to_hbm [thread:$0]  (%p864_p12), %s950_s29, 256, %s948_s22, %s376_s16, %s751_s11, %s751_s11, %s752_s27  }
 0x2aa PF: > { %s404_s28 = sand.u32 1, %s728_s12   ;;  %p1012_p10 = scmp.ne.s32.totalorder %s1002_s19, 0 }
 0x2ab   : > { %p1013_p13 = scmp.ge.s32.totalorder %s740_s15, 2  ;;  %s405_s23 = scalar_lea.sflag [#allocation4], %s404_s28 }
 0x2ad   : > { %p548_p3 = pnand %p1013_p13, %p1012_p10 }
 0x2af   : > { %723 = dma.done.wait (!%p548_p3), %s405_s23, 256  }
 0x2b0   : > { %725 = vsyncadd (!%p548_p3), %s405_s23, 4294967040  ;;  %p17_p7 = scmp.ge.s32.totalorder %s829_s24, 4   ;;  %s1014_s12 = smov %s732_s13 }
 0x2b1   : > { %s1015_s13 = smov %s736_s14  ;;  %s1016_s14 = smov %s860_s17 }
 0x2b2   : > { %s1017_s15 = smov %s829_s24  ;;  %19 = sbr.rel (!%p17_p7) target bundleno = 6 (0x6), region = 81 }
 0x2b9   :  { %410 = vsyncpa [#allocation3], 1 }
 0x2ba   :  { %412 = vsyncpa [#allocation3 + $0x1], 1 }
 0x2bb   :  { %413 = vsyncpa [#allocation6], 1 }
 0x2bc   :  { %414 = vsyncpa [#allocation4], 1 }
 0x2bd   :  { %416 = vsyncpa [#allocation4 + $0x1], 1 }

</bundles_post_ra>
